<compile_context>
chip_gen: v7x
topology: tpu7x:2x2x1
jax: 0.10.0
libtpu: 0.0.40
codegen_flags: <defaults>
</compile_context>

<pallas_src>
import math
from functools import partial

import jax
import jax.numpy as jnp
from jax.experimental import pallas as pl
from jax.experimental.pallas import tpu as pltpu


# ------------------ fused backbone stand-in + Neck kernel -------------------
# TODO(synk): the pretrained open_clip ViT-H-14 transformer stack (attention
# blocks + checkpoint weights) is an external model and is not reproduced
# here; only the patch-embed / mean-pool / ln_post skeleton is implemented.

def backbone_neck_kernel(patches_ref, wp_ref, bp_ref, ln_g_ref, ln_b_ref,
                         w1_ref, b1_ref, bn_g_ref, bn_b_ref, prelu_a_ref,
                         emb_ref, xn_ref, pool_acc,
                         *, batch, batch_pad, n_patch):
    k = pl.program_id(0)

    @pl.when(k == 0)
    def _():
        pool_acc[...] = jnp.zeros_like(pool_acc)

    width = pool_acc.shape[-1]
    pt = patches_ref.shape[0] // batch_pad
    # bf16 x bf16 -> f32 accumulation on the MXU.
    tok = jnp.dot(patches_ref[...], wp_ref[...],
                  preferred_element_type=jnp.float32)          # (pt*Bp, W) f32
    # rows are patch-major / batch-minor, so this split is tile-aligned
    # (batch_pad is a multiple of 8) and the patch-sum is a cheap reduce.
    pool_acc[...] += tok.reshape(pt, batch_pad, width).sum(axis=0)

    @pl.when(k == pl.num_programs(0) - 1)
    def _():
        # mean pool over all patches (+ patch-embed bias applied once)
        pooled = pool_acc[...] * (1.0 / n_patch) + bp_ref[...]
        # LayerNorm (ln_post stand-in), eps=1e-5
        mu = jnp.mean(pooled, axis=-1, keepdims=True)
        var = jnp.mean((pooled - mu) ** 2, axis=-1, keepdims=True)
        emb0 = ((pooled - mu) * jax.lax.rsqrt(var + 1e-5)
                * ln_g_ref[...] + ln_b_ref[...])

        # Neck 'option-D': Linear -> BatchNorm1d (batch stats) -> PReLU
        y = jnp.dot(emb0.astype(jnp.bfloat16), w1_ref[...],
                    preferred_element_type=jnp.float32) + b1_ref[...]
        # mask zero-padded batch rows so BN statistics use the real batch only
        rows = jax.lax.broadcasted_iota(jnp.int32, (batch_pad, 1), 0)
        valid = rows < batch
        inv_n = 1.0 / batch
        bmu = jnp.sum(jnp.where(valid, y, 0.0), axis=0, keepdims=True) * inv_n
        d = y - bmu
        bvar = jnp.sum(jnp.where(valid, d * d, 0.0), axis=0,
                       keepdims=True) * inv_n                   # biased variance
        yhat = d * jax.lax.rsqrt(bvar + 1e-5) * bn_g_ref[...] + bn_b_ref[...]
        a = prelu_a_ref[0]                                      # scalar from SMEM
        emb = jnp.where(yhat >= 0.0, yhat, a * yhat)            # PReLU
        emb_ref[...] = emb

        # row-L2 normalization; zero rows (batch padding) map to zero instead
        # of inf/NaN so they cannot pollute downstream tiles.
        sq = jnp.sum(emb * emb, axis=-1, keepdims=True)
        inv_norm = jnp.where(sq > 0.0, jax.lax.rsqrt(sq), 0.0)
        xn_ref[...] = (emb * inv_norm).astype(xn_ref.dtype)


# ----------------------------- ArcFace kernel --------------------------------

def arcface_kernel(xn_ref, w_ref, lab_ref, out_ref, *, cos_m, sin_m, s, tn):
    # xn_ref : (BT, E)  bf16 unit rows
    # w_ref  : (E, TN)  f32 raw class weights (streamed tile)
    # lab_ref: (BT, 1)  int32 labels
    j = pl.program_id(0)
    w = w_ref[...]
    # per-class L2 norm computed in-kernel (sublane reduce); the max() guard
    # keeps zero-padded class columns finite (they are sliced off anyway).
    inv_cn = jax.lax.rsqrt(
        jnp.maximum(jnp.sum(w * w, axis=0, keepdims=True), 1e-30))
    cos = jnp.dot(xn_ref[...], w.astype(jnp.bfloat16),
                  preferred_element_type=jnp.float32) * inv_cn   # (BT, TN) f32
    bt, tn_cur = out_ref.shape
    class_ids = jax.lax.broadcasted_iota(jnp.int32, (bt, tn_cur), 1) + j * tn
    is_label = class_ids == lab_ref[...]
    # clamp: bf16-rounded unit vectors can give cos^2 slightly > 1 -> NaN
    sin = jnp.sqrt(jnp.maximum(1.0 - cos * cos, 0.0))
    out_ref[...] = jnp.where(is_label, cos * cos_m - sin * sin_m, cos) * s


# ------------------------------- wrapper --------------------------------------

def classifier_forward(x, labels, params, *, patch, cos_m, sin_m, s,
                       class_tile=1024, batch_tile=256, patch_tile=64):
    """Returns (emb, arcface_logits), mirroring Classifier_model.forward.

    class_tile: 1024 is safe on v5e (16 MiB scoped VMEM) and keeps >=2 class
    tiles on v7x (2 TCs) at 9691 classes; raise to 2048 on v6e (32 MiB scoped).
    """
    B, C, H, W = x.shape
    p = patch
    P = (H // p) * (W // p)
    patch_dim = C * p * p
    width = params["wp"].shape[1]
    emb_dim = params["w1"].shape[1]
    n_cls = params["wfc_t"].shape[1]

    # ---- batch padding to a multiple of 8 (sublane-dense tiles); BN stats
    #      and returned results only use the first B rows.
    if B <= batch_tile:
        bt = b_pad = pl.cdiv(B, 8) * 8
    else:
        bt = batch_tile                      # multiple of 8 (256 on v6e/v7x)
        b_pad = pl.cdiv(B, bt) * bt
    if b_pad != B:
        x = jnp.pad(x, ((0, b_pad - B), (0, 0), (0, 0), (0, 0)))
        labels = jnp.pad(labels, (0, b_pad - B))

    # ---- glue: NCHW -> patch matrix, patch-major / batch-minor row order so
    #      each grid block holds `pt` whole patch slices across the batch.
    patches = x.reshape(b_pad, C, H // p, p, W // p, p)
    patches = patches.transpose(2, 4, 0, 1, 3, 5).reshape(P * b_pad, patch_dim)
    patches = patches.astype(jnp.bfloat16)                   # bf16 MXU operand

    pt = patch_tile if (P % patch_tile == 0 and patch_tile < P) else P

    vmem = pl.BlockSpec(memory_space=pltpu.MemorySpace.VMEM)
    smem = pl.BlockSpec(memory_space=pltpu.MemorySpace.SMEM)

    # 1+2) backbone stand-in + Neck, gridded over the patch axis (accumulator
    #      pattern); also emits unit-norm bf16 embedding for the ArcFace head.
    emb_pad, xn = pl.pallas_call(
        partial(backbone_neck_kernel, batch=B, batch_pad=b_pad, n_patch=P),
        out_shape=(jax.ShapeDtypeStruct((b_pad, emb_dim), jnp.float32),
                   jax.ShapeDtypeStruct((b_pad, emb_dim), jnp.bfloat16)),
        grid=(P // pt,),
        in_specs=[pl.BlockSpec((pt * b_pad, patch_dim), lambda k: (k, 0))]
                 + [vmem] * 8 + [smem],
        out_specs=(pl.BlockSpec((b_pad, emb_dim), lambda k: (0, 0)),
                   pl.BlockSpec((b_pad, emb_dim), lambda k: (0, 0))),
        scratch_shapes=[pltpu.VMEM((b_pad, width), jnp.float32)],
        compiler_params=pltpu.CompilerParams(
            dimension_semantics=("arbitrary",)),
    )(patches,
      params["wp"].astype(jnp.bfloat16), params["bp"],
      params["ln_g"], params["ln_b"],
      params["w1"].astype(jnp.bfloat16), params["b1"],
      params["bn_g"], params["bn_b"], params["prelu_a"])

    # 3) ArcFace head: stream the RAW f32 class weights, normalize per class
    #    inside the kernel (no wrapper-side normalize/cast/extra HBM pass).
    wfc = params["wfc_t"]                                    # (E, C) f32
    if n_cls <= class_tile:
        tn, n_pad = n_cls, n_cls                             # single full tile
    else:
        tn = class_tile                                      # multiple of 128
        n_pad = pl.cdiv(n_cls, tn) * tn
        # TODO(synk): for frozen/inference weights hoist this pad (and the
        # per-class normalization) out of the per-step path entirely.
        wfc = jnp.pad(wfc, ((0, 0), (0, n_pad - n_cls)))

    labels_2d = labels.astype(jnp.int32).reshape(b_pad, 1)

    logits_pad = pl.pallas_call(
        partial(arcface_kernel, cos_m=cos_m, sin_m=sin_m, s=s, tn=tn),
        out_shape=jax.ShapeDtypeStruct((b_pad, n_pad), jnp.float32),
        grid=(n_pad // tn, b_pad // bt),       # class outer, batch inner ->
        in_specs=[                             # W tile DMA'd once per class tile
            pl.BlockSpec((bt, emb_dim), lambda j, b: (b, 0)),   # xn
            pl.BlockSpec((emb_dim, tn), lambda j, b: (0, j)),   # streamed W
            pl.BlockSpec((bt, 1), lambda j, b: (b, 0)),         # labels
        ],
        out_specs=pl.BlockSpec((bt, tn), lambda j, b: (b, j)),  # lane-dense
        compiler_params=pltpu.CompilerParams(
            dimension_semantics=("parallel", "parallel")),      # v7x 2-TC shard
    )(xn, wfc, labels_2d)

    return emb_pad[:B], logits_pad[:B, :n_cls]


# --------------------------------- main ---------------------------------------

if __name__ == "__main__":
    # Small shapes consistent with the module (scaled-down ViT / ArcFace dims)
    B = 2
    C_IN, H, W_IMG = 3, 16, 16
    PATCH = 8
    WIDTH = 128         # ViT width stand-in (real ViT-H-14: 1280)
    EMB = 128           # config.embedding_size stand-in (real: 1280)
    N_CLS = 16          # config.num_classes stand-in (real: 9691)
    M, S = 0.6, 30.0    # ArcFace margin / scale (config.m, config.s)

    key = jax.random.PRNGKey(0)
    ks = jax.random.split(key, 8)

    patch_dim = C_IN * PATCH * PATCH
    params = {
        # backbone stand-in (patch embed + ln_post)
        "wp":   jax.random.normal(ks[0], (patch_dim, WIDTH), jnp.float32) * 0.02,
        "bp":   jnp.zeros((1, WIDTH), jnp.float32),
        "ln_g": jnp.ones((1, WIDTH), jnp.float32),
        "ln_b": jnp.zeros((1, WIDTH), jnp.float32),
        # Neck 'option-D': Linear(WIDTH -> EMB) + BatchNorm1d + PReLU
        "w1":      jax.random.normal(ks[1], (WIDTH, EMB), jnp.float32) * 0.05,
        "b1":      jax.random.normal(ks[2], (1, EMB), jnp.float32) * 0.01,
        "bn_g":    jnp.ones((1, EMB), jnp.float32),
        "bn_b":    jnp.zeros((1, EMB), jnp.float32),
        "prelu_a": jnp.full((1,), 0.25, jnp.float32),
        # ArcFace: fc.weight is (N_CLS, EMB) in PyTorch; store transposed, raw
        "wfc_t": (jax.random.normal(ks[3], (N_CLS, EMB), jnp.float32) * 0.05).T,
    }

    x = jax.random.normal(ks[4], (B, C_IN, H, W_IMG), jnp.float32)
    labels = jax.random.randint(ks[5], (B,), 0, N_CLS, jnp.int32)

    fwd = jax.jit(partial(classifier_forward, patch=PATCH,
                          cos_m=math.cos(M), sin_m=math.sin(M), s=S))
    emb, logits = fwd(x, labels, params)
    jax.block_until_ready((emb, logits))

    assert emb.shape == (B, EMB) and logits.shape == (B, N_CLS)
    assert bool(jnp.isfinite(emb).all()) and bool(jnp.isfinite(logits).all())
    print("KERNEL_OK")
</pallas_src>

<mosaic_0001>
module attributes {stable_mosaic.version = 11 : i64} {
  func.func @arcface_kernel(%arg0: i32, %arg1: i32, %arg2: memref<8x128xbf16, #tpu.memory_space<vmem>>, %arg3: memref<128x16xf32, #tpu.memory_space<vmem>>, %arg4: memref<8x1xi32, #tpu.memory_space<vmem>>, %arg5: memref<8x16xf32, #tpu.memory_space<vmem>>) attributes {dimension_semantics = [#tpu.dimension_semantics<parallel>, #tpu.dimension_semantics<parallel>], iteration_bounds = array<i64: 1, 1>, scalar_prefetch = 0 : i64, scratch_operands = 0 : i64, tpu.core_type = #tpu.core_type<tc>, window_params = [{transform_indices = @transform_0, window_bounds = array<i64: 8, 128>}, {transform_indices = @transform_1, window_bounds = array<i64: 128, 16>}, {transform_indices = @transform_2, window_bounds = array<i64: 8, 1>}, {transform_indices = @transform_3, window_bounds = array<i64: 8, 16>}]} {
    %c0 = arith.constant 0 : index
    %c0_0 = arith.constant 0 : index
    %0 = vector.load %arg3[%c0, %c0_0] : memref<128x16xf32, #tpu.memory_space<vmem>>, vector<128x16xf32>
    %1 = arith.mulf %0, %0 : vector<128x16xf32>
    %cst = arith.constant dense<0.000000e+00> : vector<16xf32>
    %2 = vector.multi_reduction <add>, %1, %cst [0] : vector<128x16xf32> to vector<16xf32>
    %3 = vector.shape_cast %2 : vector<16xf32> to vector<1x16xf32>
    %cst_1 = arith.constant 1.000000e-30 : f32
    %4 = vector.broadcast %cst_1 : f32 to vector<1x16xf32>
    %5 = arith.maximumf %3, %4 : vector<1x16xf32>
    %6 = math.rsqrt %5 : vector<1x16xf32>
    %c0_2 = arith.constant 0 : index
    %c0_3 = arith.constant 0 : index
    %7 = vector.load %arg2[%c0_2, %c0_3] : memref<8x128xbf16, #tpu.memory_space<vmem>>, vector<8x128xbf16>
    %8 = arith.truncf %0 : vector<128x16xf32> to vector<128x16xbf16>
    %cst_4 = arith.constant dense<0.000000e+00> : vector<8x16xf32>
    %9 = tpu.matmul %7, %8, %cst_4 {dimension_numbers = #tpu.dot_dimension_numbers<[1], [0], [0], [1], [0, 0, 1, 1], [], []>} : vector<8x128xbf16>, vector<128x16xbf16>, vector<8x16xf32> -> vector<8x16xf32>
    %10 = vector.broadcast %6 : vector<1x16xf32> to vector<8x16xf32>
    %11 = arith.mulf %9, %10 : vector<8x16xf32>
    %12 = tpu.iota {dimensions = array<i32: 1>} : vector<8x16xi32>
    %c16_i32 = arith.constant 16 : i32
    %13 = arith.muli %arg0, %c16_i32 : i32
    %14 = vector.broadcast %13 : i32 to vector<8x16xi32>
    %15 = arith.addi %12, %14 : vector<8x16xi32>
    %c0_5 = arith.constant 0 : index
    %c0_6 = arith.constant 0 : index
    %16 = vector.load %arg4[%c0_5, %c0_6] : memref<8x1xi32, #tpu.memory_space<vmem>>, vector<8x1xi32>
    %17 = vector.broadcast %16 : vector<8x1xi32> to vector<8x16xi32>
    %18 = arith.cmpi eq, %15, %17 : vector<8x16xi32>
    %19 = arith.mulf %11, %11 : vector<8x16xf32>
    %cst_7 = arith.constant 1.000000e+00 : f32
    %20 = vector.broadcast %cst_7 : f32 to vector<8x16xf32>
    %21 = arith.subf %20, %19 : vector<8x16xf32>
    %cst_8 = arith.constant 0.000000e+00 : f32
    %22 = vector.broadcast %cst_8 : f32 to vector<8x16xf32>
    %23 = arith.maximumf %21, %22 : vector<8x16xf32>
    %24 = math.sqrt %23 : vector<8x16xf32>
    %cst_9 = arith.constant 0.825335621 : f32
    %25 = vector.broadcast %cst_9 : f32 to vector<8x16xf32>
    %26 = arith.mulf %11, %25 : vector<8x16xf32>
    %cst_10 = arith.constant 0.564642489 : f32
    %27 = vector.broadcast %cst_10 : f32 to vector<8x16xf32>
    %28 = arith.mulf %24, %27 : vector<8x16xf32>
    %29 = arith.subf %26, %28 : vector<8x16xf32>
    %30 = arith.select %18, %29, %11 : vector<8x16xi1>, vector<8x16xf32>
    %cst_11 = arith.constant 3.000000e+01 : f32
    %31 = vector.broadcast %cst_11 : f32 to vector<8x16xf32>
    %32 = arith.mulf %30, %31 : vector<8x16xf32>
    %c0_12 = arith.constant 0 : index
    %c0_13 = arith.constant 0 : index
    %33 = vector.load %arg5[%c0_12, %c0_13] : memref<8x16xf32, #tpu.memory_space<vmem>>, vector<8x16xf32>
    tpu.vector_store %arg5[%c0_12, %c0_13], %32 {strides = array<i32>} : memref<8x16xf32, #tpu.memory_space<vmem>>, vector<8x16xf32>,
    return
  }
  func.func @transform_0(%arg0: i32, %arg1: i32) -> (i32, i32) {
    %c0_i32 = arith.constant 0 : i32
    %c0_i32_0 = arith.constant 0 : i32
    return %arg1, %c0_i32 : i32, i32
  }
  func.func @transform_1(%arg0: i32, %arg1: i32) -> (i32, i32) {
    %c0_i32 = arith.constant 0 : i32
    %c0_i32_0 = arith.constant 0 : i32
    return %c0_i32, %arg0 : i32, i32
  }
  func.func @transform_2(%arg0: i32, %arg1: i32) -> (i32, i32) {
    %c0_i32 = arith.constant 0 : i32
    %c0_i32_0 = arith.constant 0 : i32
    return %arg1, %c0_i32 : i32, i32
  }
  func.func @transform_3(%arg0: i32, %arg1: i32) -> (i32, i32) {
    %c0_i32 = arith.constant 0 : i32
    return %arg1, %arg0 : i32, i32
  }
}

module attributes {stable_mosaic.version = 11 : i64} {
  func.func @backbone_neck_kernel(%arg0: i32, %arg1: memref<32x192xbf16, #tpu.memory_space<vmem>>, %arg2: memref<192x128xbf16, #tpu.memory_space<vmem>>, %arg3: memref<1x128xf32, #tpu.memory_space<vmem>>, %arg4: memref<1x128xf32, #tpu.memory_space<vmem>>, %arg5: memref<1x128xf32, #tpu.memory_space<vmem>>, %arg6: memref<128x128xbf16, #tpu.memory_space<vmem>>, %arg7: memref<1x128xf32, #tpu.memory_space<vmem>>, %arg8: memref<1x128xf32, #tpu.memory_space<vmem>>, %arg9: memref<1x128xf32, #tpu.memory_space<vmem>>, %arg10: memref<1xf32, #tpu.memory_space<smem>>, %arg11: memref<8x128xf32, #tpu.memory_space<vmem>>, %arg12: memref<8x128xbf16, #tpu.memory_space<vmem>>, %arg13: memref<8x128xf32, #tpu.memory_space<vmem>>) attributes {dimension_semantics = [#tpu.dimension_semantics<arbitrary>], iteration_bounds = array<i64: 1>, scalar_prefetch = 0 : i64, scratch_operands = 1 : i64, tpu.core_type = #tpu.core_type<tc>, window_params = [{transform_indices = @transform_0, window_bounds = array<i64: 32, 192>}, {pipeline_mode = #tpu.pipeline_mode<synchronous>, transform_indices = @transform_1, window_bounds = array<i64: 192, 128>}, {pipeline_mode = #tpu.pipeline_mode<synchronous>, transform_indices = @transform_2, window_bounds = array<i64: 1, 128>}, {pipeline_mode = #tpu.pipeline_mode<synchronous>, transform_indices = @transform_3, window_bounds = array<i64: 1, 128>}, {pipeline_mode = #tpu.pipeline_mode<synchronous>, transform_indices = @transform_4, window_bounds = array<i64: 1, 128>}, {pipeline_mode = #tpu.pipeline_mode<synchronous>, transform_indices = @transform_5, window_bounds = array<i64: 128, 128>}, {pipeline_mode = #tpu.pipeline_mode<synchronous>, transform_indices = @transform_6, window_bounds = array<i64: 1, 128>}, {pipeline_mode = #tpu.pipeline_mode<synchronous>, transform_indices = @transform_7, window_bounds = array<i64: 1, 128>}, {pipeline_mode = #tpu.pipeline_mode<synchronous>, transform_indices = @transform_8, window_bounds = array<i64: 1, 128>}, {transform_indices = @transform_9, window_bounds = array<i64: 1>}, {pipeline_mode = #tpu.pipeline_mode<synchronous>, transform_indices = @transform_10, window_bounds = array<i64: 8, 128>}, {pipeline_mode = #tpu.pipeline_mode<synchronous>, transform_indices = @transform_11, window_bounds = array<i64: 8, 128>}]} {
    %c0_i32 = arith.constant 0 : i32
    %0 = arith.cmpi eq, %arg0, %c0_i32 : i32
    %1 = arith.extui %0 : i1 to i32
    %c0_i32_0 = arith.constant 0 : i32
    %2 = arith.cmpi ne, %1, %c0_i32_0 : i32
    scf.if %2 {
      %cst_11 = arith.constant 0.000000e+00 : f32
      %14 = vector.broadcast %cst_11 : f32 to vector<8x128xf32>
      %c0_12 = arith.constant 0 : index
      %c0_13 = arith.constant 0 : index
      %15 = vector.load %arg13[%c0_12, %c0_13] : memref<8x128xf32, #tpu.memory_space<vmem>>, vector<8x128xf32>
      tpu.vector_store %arg13[%c0_12, %c0_13], %14 {strides = array<i32>} : memref<8x128xf32, #tpu.memory_space<vmem>>, vector<8x128xf32>,
    } else {
    }
    %c0 = arith.constant 0 : index
    %c0_1 = arith.constant 0 : index
    %3 = vector.load %arg1[%c0, %c0_1] : memref<32x192xbf16, #tpu.memory_space<vmem>>, vector<32x192xbf16>
    %c0_2 = arith.constant 0 : index
    %c0_3 = arith.constant 0 : index
    %4 = vector.load %arg2[%c0_2, %c0_3] : memref<192x128xbf16, #tpu.memory_space<vmem>>, vector<192x128xbf16>
    %cst = arith.constant dense<0.000000e+00> : vector<32x128xf32>
    %5 = tpu.matmul %3, %4, %cst {dimension_numbers = #tpu.dot_dimension_numbers<[1], [0], [0], [1], [0, 0, 1, 1], [], []>} : vector<32x192xbf16>, vector<192x128xbf16>, vector<32x128xf32> -> vector<32x128xf32>
    %c0_4 = arith.constant 0 : index
    %c0_5 = arith.constant 0 : index
    %6 = vector.load %arg13[%c0_4, %c0_5] : memref<8x128xf32, #tpu.memory_space<vmem>>, vector<8x128xf32>
    %7 = vector.shape_cast %5 : vector<32x128xf32> to vector<4x8x128xf32>
    %cst_6 = arith.constant dense<0.000000e+00> : vector<8x128xf32>
    %8 = vector.multi_reduction <add>, %7, %cst_6 [0] : vector<4x8x128xf32> to vector<8x128xf32>
    %9 = arith.addf %6, %8 : vector<8x128xf32>
    %c0_7 = arith.constant 0 : index
    %c0_8 = arith.constant 0 : index
    %10 = vector.load %arg13[%c0_7, %c0_8] : memref<8x128xf32, #tpu.memory_space<vmem>>, vector<8x128xf32>
    tpu.vector_store %arg13[%c0_7, %c0_8], %9 {strides = array<i32>} : memref<8x128xf32, #tpu.memory_space<vmem>>, vector<8x128xf32>,
    %c0_i32_9 = arith.constant 0 : i32
    %11 = arith.cmpi eq, %arg0, %c0_i32_9 : i32
    %12 = arith.extui %11 : i1 to i32
    %c0_i32_10 = arith.constant 0 : i32
    %13 = arith.cmpi ne, %12, %c0_i32_10 : i32
    scf.if %13 {
      %c0_11 = arith.constant 0 : index
      %c0_12 = arith.constant 0 : index
      %14 = vector.load %arg13[%c0_11, %c0_12] : memref<8x128xf32, #tpu.memory_space<vmem>>, vector<8x128xf32>
      %cst_13 = arith.constant 2.500000e-01 : f32
      %15 = vector.broadcast %cst_13 : f32 to vector<8x128xf32>
      %16 = arith.mulf %14, %15 : vector<8x128xf32>
      %c0_14 = arith.constant 0 : index
      %c0_15 = arith.constant 0 : index
      %17 = vector.load %arg3[%c0_14, %c0_15] : memref<1x128xf32, #tpu.memory_space<vmem>>, vector<1x128xf32>
      %18 = vector.broadcast %17 : vector<1x128xf32> to vector<8x128xf32>
      %19 = arith.addf %16, %18 : vector<8x128xf32>
      %cst_16 = arith.constant dense<0.000000e+00> : vector<8xf32>
      %20 = vector.multi_reduction <add>, %19, %cst_16 [1] : vector<8x128xf32> to vector<8xf32>
      %21 = vector.shape_cast %20 : vector<8xf32> to vector<8x1xf32>
      %cst_17 = arith.constant 1.280000e+02 : f32
      %22 = vector.broadcast %cst_17 : f32 to vector<8x1xf32>
      %23 = arith.divf %21, %22 : vector<8x1xf32>
      %24 = vector.broadcast %23 : vector<8x1xf32> to vector<8x128xf32>
      %25 = arith.subf %19, %24 : vector<8x128xf32>
      %26 = arith.mulf %25, %25 : vector<8x128xf32>
      %cst_18 = arith.constant dense<0.000000e+00> : vector<8xf32>
      %27 = vector.multi_reduction <add>, %26, %cst_18 [1] : vector<8x128xf32> to vector<8xf32>
      %28 = vector.shape_cast %27 : vector<8xf32> to vector<8x1xf32>
      %cst_19 = arith.constant 1.280000e+02 : f32
      %29 = vector.broadcast %cst_19 : f32 to vector<8x1xf32>
      %30 = arith.divf %28, %29 : vector<8x1xf32>
      %31 = vector.broadcast %23 : vector<8x1xf32> to vector<8x128xf32>
      %32 = arith.subf %19, %31 : vector<8x128xf32>
      %cst_20 = arith.constant 9.99999974E-6 : f32
      %33 = vector.broadcast %cst_20 : f32 to vector<8x1xf32>
      %34 = arith.addf %30, %33 : vector<8x1xf32>
      %35 = math.rsqrt %34 : vector<8x1xf32>
      %36 = vector.broadcast %35 : vector<8x1xf32> to vector<8x128xf32>
      %37 = arith.mulf %32, %36 : vector<8x128xf32>
      %c0_21 = arith.constant 0 : index
      %c0_22 = arith.constant 0 : index
      %38 = vector.load %arg4[%c0_21, %c0_22] : memref<1x128xf32, #tpu.memory_space<vmem>>, vector<1x128xf32>
      %39 = vector.broadcast %38 : vector<1x128xf32> to vector<8x128xf32>
      %40 = arith.mulf %37, %39 : vector<8x128xf32>
      %c0_23 = arith.constant 0 : index
      %c0_24 = arith.constant 0 : index
      %41 = vector.load %arg5[%c0_23, %c0_24] : memref<1x128xf32, #tpu.memory_space<vmem>>, vector<1x128xf32>
      %42 = vector.broadcast %41 : vector<1x128xf32> to vector<8x128xf32>
      %43 = arith.addf %40, %42 : vector<8x128xf32>
      %44 = arith.truncf %43 : vector<8x128xf32> to vector<8x128xbf16>
      %c0_25 = arith.constant 0 : index
      %c0_26 = arith.constant 0 : index
      %45 = vector.load %arg6[%c0_25, %c0_26] : memref<128x128xbf16, #tpu.memory_space<vmem>>, vector<128x128xbf16>
      %cst_27 = arith.constant dense<0.000000e+00> : vector<8x128xf32>
      %46 = tpu.matmul %44, %45, %cst_27 {dimension_numbers = #tpu.dot_dimension_numbers<[1], [0], [0], [1], [0, 0, 1, 1], [], []>} : vector<8x128xbf16>, vector<128x128xbf16>, vector<8x128xf32> -> vector<8x128xf32>
      %c0_28 = arith.constant 0 : index
      %c0_29 = arith.constant 0 : index
      %47 = vector.load %arg7[%c0_28, %c0_29] : memref<1x128xf32, #tpu.memory_space<vmem>>, vector<1x128xf32>
      %48 = vector.broadcast %47 : vector<1x128xf32> to vector<8x128xf32>
      %49 = arith.addf %46, %48 : vector<8x128xf32>
      %50 = tpu.iota {dimensions = array<i32: 0>} : vector<8x1xi32>
      %c2_i32 = arith.constant 2 : i32
      %51 = vector.broadcast %c2_i32 : i32 to vector<8x1xi32>
      %52 = arith.cmpi slt, %50, %51 : vector<8x1xi32>
      %cst_30 = arith.constant 0.000000e+00 : f32
      %53 = vector.shape_cast %52 : vector<8x1xi1> to vector<8x1xi1>
      %54 = vector.broadcast %53 : vector<8x1xi1> to vector<8x128xi1>
      %55 = vector.broadcast %cst_30 : f32 to vector<8x128xf32>
      %56 = arith.select %54, %49, %55 : vector<8x128xi1>, vector<8x128xf32>
      %cst_31 = arith.constant dense<0.000000e+00> : vector<128xf32>
      %57 = vector.multi_reduction <add>, %56, %cst_31 [0] : vector<8x128xf32> to vector<128xf32>
      %58 = vector.shape_cast %57 : vector<128xf32> to vector<1x128xf32>
      %cst_32 = arith.constant 5.000000e-01 : f32
      %59 = vector.broadcast %cst_32 : f32 to vector<1x128xf32>
      %60 = arith.mulf %58, %59 : vector<1x128xf32>
      %61 = vector.broadcast %60 : vector<1x128xf32> to vector<8x128xf32>
      %62 = arith.subf %49, %61 : vector<8x128xf32>
      %63 = arith.mulf %62, %62 : vector<8x128xf32>
      %cst_33 = arith.constant 0.000000e+00 : f32
      %64 = vector.shape_cast %52 : vector<8x1xi1> to vector<8x1xi1>
      %65 = vector.broadcast %64 : vector<8x1xi1> to vector<8x128xi1>
      %66 = vector.broadcast %cst_33 : f32 to vector<8x128xf32>
      %67 = arith.select %65, %63, %66 : vector<8x128xi1>, vector<8x128xf32>
      %cst_34 = arith.constant dense<0.000000e+00> : vector<128xf32>
      %68 = vector.multi_reduction <add>, %67, %cst_34 [0] : vector<8x128xf32> to vector<128xf32>
      %69 = vector.shape_cast %68 : vector<128xf32> to vector<1x128xf32>
      %cst_35 = arith.constant 5.000000e-01 : f32
      %70 = vector.broadcast %cst_35 : f32 to vector<1x128xf32>
      %71 = arith.mulf %69, %70 : vector<1x128xf32>
      %cst_36 = arith.constant 9.99999974E-6 : f32
      %72 = vector.broadcast %cst_36 : f32 to vector<1x128xf32>
      %73 = arith.addf %71, %72 : vector<1x128xf32>
      %74 = math.rsqrt %73 : vector<1x128xf32>
      %75 = vector.broadcast %74 : vector<1x128xf32> to vector<8x128xf32>
      %76 = arith.mulf %62, %75 : vector<8x128xf32>
      %c0_37 = arith.constant 0 : index
      %c0_38 = arith.constant 0 : index
      %77 = vector.load %arg8[%c0_37, %c0_38] : memref<1x128xf32, #tpu.memory_space<vmem>>, vector<1x128xf32>
      %78 = vector.broadcast %77 : vector<1x128xf32> to vector<8x128xf32>
      %79 = arith.mulf %76, %78 : vector<8x128xf32>
      %c0_39 = arith.constant 0 : index
      %c0_40 = arith.constant 0 : index
      %80 = vector.load %arg9[%c0_39, %c0_40] : memref<1x128xf32, #tpu.memory_space<vmem>>, vector<1x128xf32>
      %81 = vector.broadcast %80 : vector<1x128xf32> to vector<8x128xf32>
      %82 = arith.addf %79, %81 : vector<8x128xf32>
      %c0_41 = arith.constant 0 : index
      %83 = memref.load %arg10[%c0_41] : memref<1xf32, #tpu.memory_space<smem>>
      %cst_42 = arith.constant 0.000000e+00 : f32
      %84 = vector.broadcast %cst_42 : f32 to vector<8x128xf32>
      %85 = arith.cmpf oge, %82, %84 : vector<8x128xf32>
      %86 = vector.broadcast %83 : f32 to vector<8x128xf32>
      %87 = arith.mulf %86, %82 : vector<8x128xf32>
      %88 = arith.select %85, %82, %87 : vector<8x128xi1>, vector<8x128xf32>
      %c0_43 = arith.constant 0 : index
      %c0_44 = arith.constant 0 : index
      %89 = vector.load %arg11[%c0_43, %c0_44] : memref<8x128xf32, #tpu.memory_space<vmem>>, vector<8x128xf32>
      tpu.vector_store %arg11[%c0_43, %c0_44], %88 {strides = array<i32>} : memref<8x128xf32, #tpu.memory_space<vmem>>, vector<8x128xf32>,
      %90 = arith.mulf %88, %88 : vector<8x128xf32>
      %cst_45 = arith.constant dense<0.000000e+00> : vector<8xf32>
      %91 = vector.multi_reduction <add>, %90, %cst_45 [1] : vector<8x128xf32> to vector<8xf32>
      %92 = vector.shape_cast %91 : vector<8xf32> to vector<8x1xf32>
      %cst_46 = arith.constant 0.000000e+00 : f32
      %93 = vector.broadcast %cst_46 : f32 to vector<8x1xf32>
      %94 = arith.cmpf ogt, %92, %93 : vector<8x1xf32>
      %95 = math.rsqrt %92 : vector<8x1xf32>
      %cst_47 = arith.constant 0.000000e+00 : f32
      %96 = vector.broadcast %cst_47 : f32 to vector<8x1xf32>
      %97 = arith.select %94, %95, %96 : vector<8x1xi1>, vector<8x1xf32>
      %98 = vector.broadcast %97 : vector<8x1xf32> to vector<8x128xf32>
      %99 = arith.mulf %88, %98 : vector<8x128xf32>
      %100 = arith.truncf %99 : vector<8x128xf32> to vector<8x128xbf16>
      %c0_48 = arith.constant 0 : index
      %c0_49 = arith.constant 0 : index
      %101 = vector.load %arg12[%c0_48, %c0_49] : memref<8x128xbf16, #tpu.memory_space<vmem>>, vector<8x128xbf16>
      tpu.vector_store %arg12[%c0_48, %c0_49], %100 {strides = array<i32>} : memref<8x128xbf16, #tpu.memory_space<vmem>>, vector<8x128xbf16>,
    } else {
    }
    return
  }
  func.func @transform_0(%arg0: i32) -> (i32, i32) {
    %c0_i32 = arith.constant 0 : i32
    %c0_i32_0 = arith.constant 0 : i32
    return %arg0, %c0_i32 : i32, i32
  }
  func.func @transform_1(%arg0: i32) -> (i32, i32) {
    %c0_i32 = arith.constant 0 : i32
    %c0_i32_0 = arith.constant 0 : i32
    %c0_i32_1 = arith.constant 0 : i32
    return %c0_i32, %c0_i32_0 : i32, i32
  }
  func.func @transform_2(%arg0: i32) -> (i32, i32) {
    %c0_i32 = arith.constant 0 : i32
    %c0_i32_0 = arith.constant 0 : i32
    %c0_i32_1 = arith.constant 0 : i32
    return %c0_i32, %c0_i32_0 : i32, i32
  }
  func.func @transform_3(%arg0: i32) -> (i32, i32) {
    %c0_i32 = arith.constant 0 : i32
    %c0_i32_0 = arith.constant 0 : i32
    %c0_i32_1 = arith.constant 0 : i32
    return %c0_i32, %c0_i32_0 : i32, i32
  }
  func.func @transform_4(%arg0: i32) -> (i32, i32) {
    %c0_i32 = arith.constant 0 : i32
    %c0_i32_0 = arith.constant 0 : i32
    %c0_i32_1 = arith.constant 0 : i32
    return %c0_i32, %c0_i32_0 : i32, i32
  }
  func.func @transform_5(%arg0: i32) -> (i32, i32) {
    %c0_i32 = arith.constant 0 : i32
    %c0_i32_0 = arith.constant 0 : i32
    %c0_i32_1 = arith.constant 0 : i32
    return %c0_i32, %c0_i32_0 : i32, i32
  }
  func.func @transform_6(%arg0: i32) -> (i32, i32) {
    %c0_i32 = arith.constant 0 : i32
    %c0_i32_0 = arith.constant 0 : i32
    %c0_i32_1 = arith.constant 0 : i32
    return %c0_i32, %c0_i32_0 : i32, i32
  }
  func.func @transform_7(%arg0: i32) -> (i32, i32) {
    %c0_i32 = arith.constant 0 : i32
    %c0_i32_0 = arith.constant 0 : i32
    %c0_i32_1 = arith.constant 0 : i32
    return %c0_i32, %c0_i32_0 : i32, i32
  }
  func.func @transform_8(%arg0: i32) -> (i32, i32) {
    %c0_i32 = arith.constant 0 : i32
    %c0_i32_0 = arith.constant 0 : i32
    %c0_i32_1 = arith.constant 0 : i32
    return %c0_i32, %c0_i32_0 : i32, i32
  }
  func.func @transform_9(%arg0: i32) -> i32 {
    %c0_i32 = arith.constant 0 : i32
    %c0_i32_0 = arith.constant 0 : i32
    return %c0_i32 : i32
  }
  func.func @transform_10(%arg0: i32) -> (i32, i32) {
    %c0_i32 = arith.constant 0 : i32
    %c0_i32_0 = arith.constant 0 : i32
    %c0_i32_1 = arith.constant 0 : i32
    return %c0_i32, %c0_i32_0 : i32, i32
  }
  func.func @transform_11(%arg0: i32) -> (i32, i32) {
    %c0_i32 = arith.constant 0 : i32
    %c0_i32_0 = arith.constant 0 : i32
    %c0_i32_1 = arith.constant 0 : i32
    return %c0_i32, %c0_i32_0 : i32, i32
  }
}

</mosaic_0001>

<bundles_post_ra>
// kernel: classifier_forward.3
= control target key start
LH: loop header
LB: loop body
LE: loop exit
PB: predicated region body
PF: predicated region fallthrough
CT: control target
= control target key end

     0   :  { %v204_v0 = vmov 0.0   ;;  %vm47_vm0 = vcmask 130048   ;;  %vm205_vm1 = vmmov 0   ;;  %v206_v9 = vmov 0   ;;  %s310_s1 = inlined_call_operand.vmem [shape: f32[128,16], index: 1, kind: input, shape index: {}]   ;;  %s311_s2 = inlined_call_operand.vmem [shape: s32[8,1], index: 2, kind: input, shape index: {}]   ;;  %s312_s0 = inlined_call_operand.vmem [shape: bf16[8,128], index: 0, kind: input, shape index: {}]   ;;  %s313_s3 = inlined_call_operand.vmem [shape: f32[8,16], index: 3, kind: output, shape index: {}]  }
   0x1   :  { %176 = vmatprep.subr.bf16.mxu0 %v204_v0  ;;  %v15_v1 = vld [vmem:[%s310_s1] sm:$0xff]  ;;  %v16_v2 = vld [vmem:[%s310_s1 + $0x8] sm:$0xff]  ;;  %v17_v3 = vld [vmem:[%s310_s1 + $0x10] sm:$0xff]  ;;  %192 = vmatprep.mubr.msk.bf16.mxu0 %vm205_vm1, %v204_v0 }
   0x2   :  { %v31_v4 = vmul.f32 %v15_v1, %v15_v1  ;;  %v32_v5 = vmul.f32 %v16_v2, %v16_v2  ;;  %v88_v6 = vpack.c.bf16 %v16_v2, %v15_v1  ;;  %v18_v7 = vld [vmem:[%s310_s1 + $0x18] sm:$0xff]  ;;  %v33_v8 = vmul.f32 %v17_v3, %v17_v3  ;;  %199 = vset.pattern.permute.xlu0 %v206_v9  ;;  %v19_v12 = vld [vmem:[%s310_s1 + $0x20] sm:$0xff]  ;;  %v20_v18 = vld [vmem:[%s310_s1 + $0x28] sm:$0xff] }
   0x3   :  { %v34_v10 = vmul.f32 %v18_v7, %v18_v7  ;;  %v89_v11 = vpack.c.bf16 %v18_v7, %v17_v3  ;;  %v35_v16 = vmul.f32 %v19_v12, %v19_v12  ;;  %v36_v20 = vmul.f32 %v20_v18, %v20_v18  ;;  %v142_v21 = vld [vmem:[%s311_s2] sm:$0xff]  ;;  %v21_v23 = vld [vmem:[%s310_s1 + $0x30] sm:$0xff]  ;;  %v22_v28 = vld [vmem:[%s310_s1 + $0x38] sm:$0xff] }
   0x4   :  { %v48_v13 = vsel %vm47_vm0, %v31_v4, 0.0  ;;  %v49_v14 = vsel %vm47_vm0, %v32_v5, 0.0  ;;  %177 = vmatpush3.bf16.msra.mxu0 %v88_v6  ;;  %v51_v15 = vsel %vm47_vm0, %v33_v8, 0.0  ;;  %144 = vperm.xlu0 %199, %v142_v21   ;;  %v90_v25 = vpack.c.bf16 %v20_v18, %v19_v12  ;;  %v23_v32 = vld [vmem:[%s310_s1 + $0x40] sm:$0xff]  ;;  %v24_v37 = vld [vmem:[%s310_s1 + $0x48] sm:$0xff]  ;;  %v25_v41 = vld [vmem:[%s310_s1 + $0x50] sm:$0xff] }
   0x5   :  { %v50_v17 = vadd.f32 %v49_v14, %v48_v13  ;;  %178 = vmatprep.subr.bf16.mxu0 %v204_v0  ;;  %v53_v19 = vsel %vm47_vm0, %v34_v10, 0.0  ;;  %v55_v24 = vsel %vm47_vm0, %v35_v16, 0.0  ;;  %v37_v26 = vmul.f32 %v21_v23, %v21_v23  ;;  %v26_v46 = vld [vmem:[%s310_s1 + $0x58] sm:$0xff]  ;;  %v27_v50 = vld [vmem:[%s310_s1 + $0x60] sm:$0xff]  ;;  %v28_v55 = vld [vmem:[%s310_s1 + $0x68] sm:$0xff] }
   0x6   :  { %v57_v29 = vsel %vm47_vm0, %v36_v20, 0.0  ;;  %v38_v30 = vmul.f32 %v22_v28, %v22_v28  ;;  %v91_v34 = vpack.c.bf16 %v22_v28, %v21_v23  ;;  %v39_v35 = vmul.f32 %v23_v32, %v23_v32  ;;  %v29_v59 = vld [vmem:[%s310_s1 + $0x70] sm:$0xff]  ;;  %v30_v1 = vld [vmem:[%s310_s1 + $0x78] sm:$0xff]  ;;  %v87_v10 = vld [vmem:[%s312_s0] sm:$0xf] }
   0x7   :  { %v52_v22 = vadd.f32 %v51_v15, %v50_v17  ;;  %v59_v33 = vsel %vm47_vm0, %v37_v26, 0.0  ;;  %v40_v39 = vmul.f32 %v24_v37, %v24_v37  ;;  %v92_v43 = vpack.c.bf16 %v24_v37, %v23_v32 }
   0x8   :  { %179 = vmatpush3.bf16.msra.mxu0 %v89_v11  ;;  %v61_v38 = vsel %vm47_vm0, %v38_v30, 0.0  ;;  %v63_v42 = vsel %vm47_vm0, %v39_v35, 0.0  ;;  %v41_v44 = vmul.f32 %v25_v41, %v25_v41  ;;  %v42_v48 = vmul.f32 %v26_v46, %v26_v46 }
   0x9   :  { %v54_v27 = vadd.f32 %v53_v19, %v52_v22  ;;  %180 = vmatprep.subr.bf16.mxu0 %v204_v0  ;;  %v65_v47 = vsel %vm47_vm0, %v40_v39, 0.0  ;;  %v93_v52 = vpack.c.bf16 %v26_v46, %v25_v41  ;;  %v43_v53 = vmul.f32 %v27_v50, %v27_v50 }
   0xa   :  { %v67_v51 = vsel %vm47_vm0, %v41_v44, 0.0  ;;  %v69_v56 = vsel %vm47_vm0, %v42_v48, 0.0  ;;  %v44_v57 = vmul.f32 %v28_v55, %v28_v55  ;;  %v94_v61 = vpack.c.bf16 %v28_v55, %v27_v50 }
   0xb   :  { %v56_v31 = vadd.f32 %v55_v24, %v54_v27  ;;  %v71_v60 = vsel %vm47_vm0, %v43_v53, 0.0  ;;  %v45_v62 = vmul.f32 %v29_v59, %v29_v59  ;;  %v46_v3 = vmul.f32 %v30_v1, %v30_v1 }
   0xc   :  { %181 = vmatpush3.bf16.msra.mxu0 %v90_v25  ;;  %v73_v2 = vsel %vm47_vm0, %v44_v57, 0.0  ;;  %v95_v6 = vpack.c.bf16 %v30_v1, %v29_v59  ;;  %v137_v27 = vlaneseq }
   0xd   :  { %v58_v36 = vadd.f32 %v57_v29, %v56_v31  ;;  %182 = vmatprep.subr.bf16.mxu0 %v204_v0  ;;  %v75_v5 = vsel %vm47_vm0, %v45_v62, 0.0  ;;  %v77_v8 = vsel %vm47_vm0, %v46_v3, 0.0 }
   0xe   :  { %v138_v31 = vand.u32 127, %v137_v27 }
   0xf   :  { %v60_v40 = vadd.f32 %v59_v33, %v58_v36 }
  0x10   :  { %183 = vmatpush3.bf16.msra.mxu0 %v91_v34 }
  0x11   :  { %v62_v45 = vadd.f32 %v61_v38, %v60_v40  ;;  %184 = vmatprep.subr.bf16.mxu0 %v204_v0 }
  0x13   :  { %v64_v49 = vadd.f32 %v63_v42, %v62_v45 }
  0x14   :  { %185 = vmatpush3.bf16.msra.mxu0 %v92_v43 }
  0x15   :  { %v66_v54 = vadd.f32 %v65_v47, %v64_v49  ;;  %186 = vmatprep.subr.bf16.mxu0 %v204_v0 }
  0x17   :  { %v68_v58 = vadd.f32 %v67_v51, %v66_v54 }
  0x18   :  { %187 = vmatpush3.bf16.msra.mxu0 %v93_v52 }
  0x19   :  { %v70_v63 = vadd.f32 %v69_v56, %v68_v58  ;;  %188 = vmatprep.subr.bf16.mxu0 %v204_v0 }
  0x1b   :  { %v72_v4 = vadd.f32 %v71_v60, %v70_v63 }
  0x1c   :  { %189 = vmatpush3.bf16.msra.mxu0 %v94_v61 }
  0x1d   :  { %v74_v7 = vadd.f32 %v73_v2, %v72_v4  ;;  %190 = vmatprep.subr.bf16.mxu0 %v204_v0 }
  0x1f   :  { %v76_v9 = vadd.f32 %v75_v5, %v74_v7 }
  0x20   :  { %191 = vmatpush3.bf16.msra.mxu0 %v95_v6 }
  0x21   :  { %v78_v11 = vadd.f32 %v77_v8, %v76_v9 }
  0x23   :  { %193 = vmatmul.mubr.bf16.vlgmr.msra.gmra.mrb[0].mxu0 %v87_v10  ;;  %v79_v12 = vrot.slane %v78_v11, 4 }
  0x25   :  { %v80_v13 = vadd.f32 %v79_v12, %v78_v11 }
  0x27   :  { %v81_v14 = vrot.slane %v80_v13, 2 }
  0x29   :  { %v82_v15 = vadd.f32 %v81_v14, %v80_v13 }
  0x2b   :  { %v83_v16 = vrot.slane %v82_v15, 1 }
  0x2d   :  { %v84_v17 = vadd.f32 %v83_v16, %v82_v15 }
  0x2f   :  { %v85_v18 = vmax.f32 %v84_v17, 1e-30 }
  0x31   :  { %200 = vrsqrt.f32 %v85_v18 }
  0x3b   :  { %v201_v19 = vpop.eup %200 }
  0x83   :  { %v145_v33 = vpop.permute.xlu0 %144 }
  0x84   :  { %vm146_vm4 = vcmp.eq.s32.totalorder %v138_v31, %v145_v33 }
  0xf6   :  { %v130_v0 = vpop.f32.mrb[0].mxu0 }
  0xf7   :  { %v136_v20 = vmul.f32 %v201_v19, %v130_v0  ;;  %v194_v21 = vpop.f32.mrb[1].mxu0 }
  0xf8   :  { %v133_v22 = vpop.f32.mrb[2].mxu0 }
  0xf9   :  { %v147_v23 = vmul.f32 %v136_v20, %v136_v20  ;;  %v195_v24 = vpop.f32.mrb[3].mxu0  ;;  %v157_v35 = vmul.f32 0.8253356, %v136_v20 }
  0xfb   :  { %v148_v25 = vsub.f32 1.0, %v147_v23 }
  0xfd   :  { %v149_v26 = vmax.f32 %v148_v25, 0.0 }
  0xff   :  { %202 = vrsqrt.f32 %v149_v26  ;;  %vm152_vm2 = vcmp.eq.f32.partialorder %v149_v26, inf  ;;  %v155_v30 = vand.u32 2147483648, %v149_v26  ;;  %vm154_vm3 = vcmp.eq.f32.partialorder %v149_v26, 0.0 }
 0x109   :  { %v203_v28 = vpop.eup %202 }
 0x10a   :  { %v151_v29 = vmul.f32 %v203_v28, %v149_v26 }
 0x10c   :  { %v153_v32 = vsel %vm152_vm2, %v149_v26, %v151_v29 }
 0x10d   :  { %v156_v34 = vsel %vm154_vm3, %v155_v30, %v153_v32 }
 0x10e   :  { %v158_v36 = vmul.f32 0.5646425, %v156_v34 }
 0x110   :  { %v159_v37 = vsub.f32 %v157_v35, %v158_v36 }
 0x112   :  { %v160_v38 = vsel %vm146_vm4, %v159_v37, %v136_v20 }
 0x113   :  { %v161_v39 = vmul.f32 30.0, %v160_v38 }
 0x115   :  { %162 = vst.msk [vmem:[%s313_s3] sm:$0xff] %vm47_vm0, %v161_v39 }

// kernel: classifier_forward.2
= control target key start
LH: loop header
LB: loop body
LE: loop exit
PB: predicated region body
PF: predicated region fallthrough
CT: control target
= control target key end

     0   :  { %v538_v0 = vmov 0   ;;  %vm162_vm0 = vcmask 523264   ;;  %v539_v31 = vmov 0.0   ;;  %vm540_vm1 = vmmov 0   ;;  %s702_s1 = inlined_call_operand.vmem [shape: bf16[192,128], index: 1, kind: input, shape index: {}]   ;;  %s703_s0 = inlined_call_operand.vmem [shape: bf16[32,192], index: 0, kind: input, shape index: {}]   ;;  %s704_s2 = inlined_call_operand.vmem [shape: f32[1,128], index: 2, kind: input, shape index: {}]   ;;  %s705_s5 = inlined_call_operand.vmem [shape: bf16[128,128], index: 5, kind: input, shape index: {}]   ;;  %s706_s3 = inlined_call_operand.vmem [shape: f32[1,128], index: 3, kind: input, shape index: {}]   ;;  %s707_s4 = inlined_call_operand.vmem [shape: f32[1,128], index: 4, kind: input, shape index: {}]   ;;  %s708_s6 = inlined_call_operand.vmem [shape: f32[1,128], index: 6, kind: input, shape index: {}]   ;;  %s709_s7 = inlined_call_operand.vmem [shape: f32[1,128], index: 7, kind: input, shape index: {}]   ;;  %s710_s8 = inlined_call_operand.vmem [shape: f32[1,128], index: 8, kind: input, shape index: {}]   ;;  %s711_s9 = inlined_call_operand.<no memory space> [shape: f32[1], index: 9, kind: input, shape index: {}]   ;;  %s712_s10 = inlined_call_operand.vmem [shape: f32[8,128], index: 10, kind: output, shape index: {0}]   ;;  %s713_s11 = inlined_call_operand.vmem [shape: bf16[8,128], index: 11, kind: output, shape index: {1}]  }
   0x1   :  { %169 = vmatprep.subr.bf16.mxu0 %v538_v0  ;;  %v506_v1 = vld [vmem:[%s702_s1] sm:$0xff]   ;;  %v507_v2 = vld [vmem:[%s702_s1 + $0x8] sm:$0xff]   ;;  %v508_v3 = vld [vmem:[%s702_s1 + $0x10] sm:$0xff]   ;;  %483 = vmatprep.subr.bf16.mxu1 %v539_v31  ;;  %v377_v54 = vlaneseq }
   0x2   :  { %170 = vmatpush1.bf16.msra.mxu0 %v506_v1  ;;  %v509_v4 = vld [vmem:[%s702_s1 + $0x18] sm:$0xff]   ;;  %v520_v5 = vld [vmem:[%s703_s0 + $0x4] ss:$8 sps:$4 sm:$0xff]   ;;  %v512_v8 = vld [vmem:[%s702_s1 + $0x30] sm:$0xff]   ;;  %499 = vmatprep.mubr.msk.bf16.mxu1 %vm540_vm1, %v539_v31 }
   0x3   :  { %171 = vmatprep.subr.bf16.mxu0 %v538_v0  ;;  %v510_v6 = vld [vmem:[%s702_s1 + $0x20] sm:$0xff]   ;;  %458 = vmatprep.mubr.msk.bf16.mxu0 %vm162_vm0, %v520_v5  ;;  %v511_v7 = vld [vmem:[%s702_s1 + $0x28] sm:$0xff]   ;;  %v513_v9 = vld [vmem:[%s702_s1 + $0x38] sm:$0xff]   ;;  %v378_v55 = vshrl.u32 %v377_v54, 7 }
   0x4   :  { %v514_v10 = vld [vmem:[%s702_s1 + $0x40] sm:$0xff]   ;;  %v515_v11 = vld [vmem:[%s702_s1 + $0x48] sm:$0xff]   ;;  %v516_v12 = vld [vmem:[%s702_s1 + $0x50] sm:$0xff]  }
   0x5   :  { %v517_v13 = vld [vmem:[%s702_s1 + $0x58] sm:$0xff]   ;;  %v518_v14 = vld [vmem:[%s703_s0] ss:$8 sps:$4 sm:$0xff]   ;;  %v526_v38 = vld [vmem:[%s705_s5 + $0x10] sm:$0xff]   ;;  %vm379_vm2 = vcmp.lt.s32.totalorder %v378_v55, 2 }
   0x6   :  { %172 = vmatpush1.bf16.msra.mxu0 %v507_v2  ;;  %v521_v15 = vld [vmem:[%s703_s0 + $0x14] ss:$8 sps:$4 sm:$0xff]   ;;  %v523_v16 = vld [vmem:[%s703_s0 + $0x10] ss:$8 sps:$4 sm:$0xff]   ;;  %v460_v28 = vld [vmem:[%s704_s2] ss:$0 sm:$0xff] }
   0x7   :  { %173 = vmatprep.subr.bf16.mxu0 %v538_v0  ;;  %v524_v32 = vld [vmem:[%s705_s5] sm:$0xff]   ;;  %v525_v33 = vld [vmem:[%s705_s5 + $0x8] sm:$0xff]   ;;  %v527_v39 = vld [vmem:[%s705_s5 + $0x18] sm:$0xff]  }
   0x8   :  { %484 = vmatpush3.bf16.msra.mxu1 %v524_v32  ;;  %v528_v40 = vld [vmem:[%s705_s5 + $0x20] sm:$0xff]   ;;  %v529_v41 = vld [vmem:[%s705_s5 + $0x28] sm:$0xff]   ;;  %v530_v42 = vld [vmem:[%s705_s5 + $0x30] sm:$0xff]  }
   0x9   :  { %485 = vmatprep.subr.bf16.mxu1 %v539_v31  ;;  %v531_v43 = vld [vmem:[%s705_s5 + $0x38] sm:$0xff]   ;;  %v461_v48 = vld [vmem:[%s706_s3] ss:$0 sm:$0xff] }
   0xa   :  { %174 = vmatpush1.bf16.msra.mxu0 %v508_v3  ;;  %v462_v50 = vld [vmem:[%s707_s4] ss:$0 sm:$0xff] }
   0xb   :  { %175 = vmatprep.subr.bf16.mxu0 %v538_v0  ;;  %v463_v56 = vld [vmem:[%s708_s6] ss:$0 sm:$0xff] }
   0xc   :  { %486 = vmatpush3.bf16.msra.mxu1 %v525_v33 }
   0xd   :  { %487 = vmatprep.subr.bf16.mxu1 %v539_v31 }
   0xe   :  { %176 = vmatpush1.bf16.msra.mxu0 %v509_v4 }
   0xf   :  { %177 = vmatprep.subr.bf16.mxu0 %v538_v0 }
  0x10   :  { %488 = vmatpush3.bf16.msra.mxu1 %v526_v38 }
  0x11   :  { %489 = vmatprep.subr.bf16.mxu1 %v539_v31 }
  0x12   :  { %178 = vmatpush1.bf16.msra.mxu0 %v510_v6 }
  0x13   :  { %179 = vmatprep.subr.bf16.mxu0 %v538_v0 }
  0x14   :  { %490 = vmatpush3.bf16.msra.mxu1 %v527_v39 }
  0x15   :  { %491 = vmatprep.subr.bf16.mxu1 %v539_v31 }
  0x16   :  { %180 = vmatpush1.bf16.msra.mxu0 %v511_v7 }
  0x17   :  { %181 = vmatprep.subr.bf16.mxu0 %v538_v0 }
  0x18   :  { %492 = vmatpush3.bf16.msra.mxu1 %v528_v40 }
  0x19   :  { %493 = vmatprep.subr.bf16.mxu1 %v539_v31 }
  0x1a   :  { %182 = vmatpush1.bf16.msra.mxu0 %v512_v8 }
  0x1b   :  { %183 = vmatprep.subr.bf16.mxu0 %v538_v0 }
  0x1c   :  { %494 = vmatpush3.bf16.msra.mxu1 %v529_v41 }
  0x1d   :  { %495 = vmatprep.subr.bf16.mxu1 %v539_v31 }
  0x1e   :  { %184 = vmatpush1.bf16.msra.mxu0 %v513_v9 }
  0x1f   :  { %185 = vmatprep.subr.bf16.mxu0 %v538_v0 }
  0x20   :  { %496 = vmatpush3.bf16.msra.mxu1 %v530_v42 }
  0x21   :  { %497 = vmatprep.subr.bf16.mxu1 %v539_v31 }
  0x22   :  { %186 = vmatpush1.bf16.msra.mxu0 %v514_v10 }
  0x23   :  { %187 = vmatprep.subr.bf16.mxu0 %v538_v0 }
  0x24   :  { %498 = vmatpush3.bf16.msra.mxu1 %v531_v43 }
  0x26   :  { %188 = vmatpush1.bf16.msra.mxu0 %v515_v11 }
  0x27   :  { %189 = vmatprep.subr.bf16.mxu0 %v538_v0 }
  0x2a   :  { %190 = vmatpush1.bf16.msra.mxu0 %v516_v12 }
  0x2b   :  { %191 = vmatprep.subr.bf16.mxu0 %v538_v0 }
  0x2e   :  { %192 = vmatpush1.bf16.msra.mxu0 %v517_v13 }
  0x31   :  { %202 = vmatmul.mubr.bf16.vlgmr.msra.gmra.mrb[0].mxu0 %v518_v14 }
  0x32   :  { %459 = vmatprep.mubr.msk.bf16.mxu0 %vm162_vm0, %v521_v15 }
  0x39   :  { %210 = vmatmul.mubr.bf16.gmra.mrb[4].mxu0 %v523_v16 }
 0x104   :  { %v203_v17 = vpop.f32.mrb[0].mxu0 }
 0x105   :  { %v205_v18 = vpop.f32.mrb[1].mxu0 }
 0x106   :  { %v206_v19 = vpop.f32.mrb[2].mxu0  ;;  %v472_v18 = vld [vmem:[%s709_s7] ss:$0 sm:$0xff] }
 0x107   :  { %v219_v20 = vadd.f32 %v206_v19, %v203_v17  ;;  %v208_v21 = vpop.f32.mrb[3].mxu0 }
 0x10c   :  { %v211_v22 = vpop.f32.mrb[4].mxu0 }
 0x10d   :  { %v220_v23 = vadd.f32 %v219_v20, %v211_v22  ;;  %v213_v24 = vpop.f32.mrb[5].mxu0  ;;  %v473_v20 = vld [vmem:[%s710_s8] ss:$0 sm:$0xff]  ;;  %v421_v22 = vstv %s711_s9 }
 0x10e   :  { %v214_v25 = vpop.f32.mrb[6].mxu0 }
 0x10f   :  { %v221_v26 = vadd.f32 %v220_v23, %v214_v25  ;;  %v216_v27 = vpop.f32.mrb[7].mxu0 }
 0x111   :  { %v228_v29 = vmul.f32 0.25, %v221_v26 }
 0x113   :  { %v236_v30 = vadd.f32 %v460_v28, %v228_v29 }
 0x115   :  { %237 = vadd.xlane.f32.xlu0 %v236_v30 }
 0x1a2   :  { %v238_v34 = vpop.xlane.xlu0 %237 }
 0x1a3   :  { %v240_v35 = vmul.f32 0.0078125, %v238_v34 }
 0x1a5   :  { %v241_v36 = vsub.f32 %v236_v30, %v240_v35 }
 0x1a7   :  { %v242_v37 = vmul.f32 %v241_v36, %v241_v36 }
 0x1a9   :  { %243 = vadd.xlane.f32.xlu0 %v242_v37 }
 0x236   :  { %v244_v44 = vpop.xlane.xlu0 %243 }
 0x237   :  { %v245_v45 = vmul.f32 0.0078125, %v244_v44 }
 0x239   :  { %v246_v46 = vadd.f32 1e-05, %v245_v45 }
 0x23b   :  { %532 = vrsqrt.f32 %v246_v46 }
 0x245   :  { %v533_v47 = vpop.eup %532 }
 0x246   :  { %v248_v49 = vmul.f32 %v533_v47, %v241_v36 }
 0x248   :  { %v256_v51 = vmul.f32 %v461_v48, %v248_v49 }
 0x24a   :  { %v264_v52 = vadd.f32 %v462_v50, %v256_v51 }
 0x24c   :  { %v265_v53 = vpack.c.bf16 %v264_v52, %v264_v52 }
 0x24e   :  { %500 = vmatmul.mubr.bf16.vlgmr.msra.gmra.mrb[0].mxu1 %v265_v53 }
 0x321   :  { %v371_v57 = vpop.f32.mrb[0].mxu1 }
 0x322   :  { %v372_v58 = vadd.f32 %v463_v56, %v371_v57  ;;  %v501_v59 = vpop.f32.mrb[1].mxu1 }
 0x323   :  { %v374_v60 = vpop.f32.mrb[2].mxu1 }
 0x324   :  { %v382_v61 = vsel %vm379_vm2, %v372_v58, 0.0  ;;  %v502_v62 = vpop.f32.mrb[3].mxu1 }
 0x325   :  { %v383_v63 = vrot.slane %v382_v61, 4 }
 0x327   :  { %v384_v0 = vadd.f32 %v383_v63, %v382_v61 }
 0x329   :  { %v385_v1 = vrot.slane %v384_v0, 2 }
 0x32b   :  { %v386_v2 = vadd.f32 %v385_v1, %v384_v0 }
 0x32d   :  { %v387_v3 = vrot.slane %v386_v2, 1 }
 0x32f   :  { %v388_v4 = vadd.f32 %v387_v3, %v386_v2 }
 0x331   :  { %v389_v5 = vmul.f32 0.5, %v388_v4 }
 0x333   :  { %v390_v6 = vsub.f32 %v372_v58, %v389_v5 }
 0x335   :  { %v391_v7 = vmul.f32 %v390_v6, %v390_v6 }
 0x337   :  { %v392_v8 = vsel %vm379_vm2, %v391_v7, 0.0 }
 0x338   :  { %v393_v9 = vrot.slane %v392_v8, 4 }
 0x33a   :  { %v394_v10 = vadd.f32 %v393_v9, %v392_v8 }
 0x33c   :  { %v395_v11 = vrot.slane %v394_v10, 2 }
 0x33e   :  { %v396_v12 = vadd.f32 %v395_v11, %v394_v10 }
 0x340   :  { %v397_v13 = vrot.slane %v396_v12, 1 }
 0x342   :  { %v398_v14 = vadd.f32 %v397_v13, %v396_v12 }
 0x344   :  { %v399_v15 = vmul.f32 0.5, %v398_v14 }
 0x346   :  { %v400_v16 = vadd.f32 1e-05, %v399_v15 }
 0x348   :  { %534 = vrsqrt.f32 %v400_v16 }
 0x352   :  { %v535_v17 = vpop.eup %534 }
 0x353   :  { %v402_v19 = vmul.f32 %v535_v17, %v390_v6 }
 0x355   :  { %v410_v21 = vmul.f32 %v472_v18, %v402_v19 }
 0x357   :  { %v418_v23 = vadd.f32 %v473_v20, %v410_v21 }
 0x359   :  { %vm420_vm3 = vcmp.ge.f32.partialorder %v418_v23, 0.0  ;;  %v422_v24 = vmul.f32 %v421_v22, %v418_v23 }
 0x35b   :  { %v423_v25 = vsel %vm420_vm3, %v418_v23, %v422_v24 }
 0x35c   :  { %v425_v26 = vmul.f32 %v423_v25, %v423_v25  ;;  %424 = vst [vmem:[%s712_s10] sm:$0xff] %v423_v25 }
 0x35e   :  { %426 = vadd.xlane.f32.xlu1 %v425_v26 }
 0x3eb   :  { %v427_v27 = vpop.xlane.xlu1 %426 }
 0x3ec   :  { %536 = vrsqrt.f32 %v427_v27  ;;  %vm428_vm4 = vcmp.gt.f32.partialorder %v427_v27, 0.0 }
 0x3f6   :  { %v537_v28 = vpop.eup %536 }
 0x3f7   :  { %v430_v29 = vsel %vm428_vm4, %v537_v28, 0.0 }
 0x3f8   :  { %v431_v30 = vmul.f32 %v430_v29, %v423_v25 }
 0x3fa   :  { %v432_v31 = vpack.c.bf16 %v431_v30, %v431_v30 }
 0x3fc   :  { %433 = vst [vmem:[%s713_s11] sm:$0xf] %v432_v31 }

</bundles_post_ra>
